<compile_context>
chip_gen: v6e
topology: v6e:2x2x1
jax: 0.10.0
libtpu: 0.0.40
codegen_flags: <defaults>
</compile_context>

<pallas_src>
import functools

import jax
import jax.numpy as jnp
from jax import lax
from jax.experimental import pallas as pl
from jax.experimental.pallas import tpu as pltpu


_MXU_DIM = 256                                # fills v6e/v7x MXU; multiple of v5e's 128
_ONE_HOT_MAX_V = 2048                         # beyond this the (tile, V) one-hot is wasteful
_FAST_PATH_VMEM_BUDGET = 48 * 1024 * 1024     # v7x-safe (64 MiB physical, 2x-buffered inputs)


def _round_up(x: int, m: int) -> int:
    return ((x + m - 1) // m) * m


# ----------------------------------------------------------------------------
# Fast path: VMEM-resident table + one-hot MXU gather.
# ----------------------------------------------------------------------------
def _onehot_embed_kernel(idx_ref, w_ref, out_ref, *, v_pad, scale):
    # idx_ref: (tile, 1) int32 token ids for this tile (VMEM)
    # w_ref:   (v_pad, d) embedding table, resident in VMEM across the grid
    # out_ref: (tile, d) output tile
    ids = idx_ref[...]                                                   # (tile, 1)
    col = lax.broadcasted_iota(jnp.int32, (ids.shape[0], v_pad), 1)      # (tile, v_pad)
    one_hot = (col == ids).astype(w_ref.dtype)                           # (tile, v_pad)
    acc = jnp.dot(one_hot, w_ref[...], preferred_element_type=jnp.float32)
    out_ref[...] = (acc * scale).astype(out_ref.dtype)                   # fused sqrt(D) scale


def _token_embedding_onehot(idx, weight, n_pad, tile, scale, out_dtype):
    v, d = weight.shape
    v_pad = _round_up(max(v, _MXU_DIM), _MXU_DIM)
    w = weight
    if v_pad != v:
        w = jnp.concatenate([w, jnp.zeros((v_pad - v, d), w.dtype)], axis=0)
    idx2 = idx.reshape(n_pad, 1)

    itemsize = jnp.dtype(w.dtype).itemsize
    vmem_need = (2 * v_pad * d * itemsize            # resident table (double-buffered)
                 + tile * v_pad * 4                  # one-hot intermediate
                 + 4 * tile * d * 4                  # out tiles + acc headroom
                 + 2 * tile * 4                      # id tiles
                 + (4 << 20))                        # slack
    vmem_limit = int(min(64 * 1024 * 1024, max(32 * 1024 * 1024, vmem_need)))

    kernel = functools.partial(_onehot_embed_kernel, v_pad=v_pad, scale=scale)
    return pl.pallas_call(
        kernel,
        out_shape=jax.ShapeDtypeStruct((n_pad, d), out_dtype),
        grid_spec=pltpu.PrefetchScalarGridSpec(
            num_scalar_prefetch=0,
            grid=(n_pad // tile,),
            in_specs=[
                pl.BlockSpec((tile, 1), lambda t: (t, 0)),       # ids, tiled over tokens
                pl.BlockSpec((v_pad, d), lambda t: (0, 0)),      # table, resident (same block)
            ],
            out_specs=pl.BlockSpec((tile, d), lambda t: (t, 0)),
        ),
        compiler_params=pltpu.CompilerParams(
            dimension_semantics=("parallel",),                   # v7x megacore shardable
            vmem_limit_bytes=vmem_limit,
        ),
    )(idx2, w)


# ----------------------------------------------------------------------------
# Fallback: HBM row-gather with cross-tile double buffering.
# ----------------------------------------------------------------------------
def _dma_gather_kernel(idx_ref, w_hbm, out_ref, buf, sems, *, tile, scale):
    # idx_ref: (n_pad,) int32 in SMEM (scalar-prefetched token ids)
    # w_hbm:   (V, D) table left in HBM (pl.ANY)
    # out_ref: (tile, D) output tile (auto-pipelined)
    # buf:     (2, tile, D) VMEM double buffer
    # sems:    (2,) DMA semaphores, one per slot (shared by all row copies)
    t = pl.program_id(0)
    n_tiles = pl.num_programs(0)
    slot = t % 2

    def _row_copy(tile_idx, r, slot_idx):
        row = idx_ref[tile_idx * tile + r]
        return pltpu.make_async_copy(
            w_hbm.at[pl.ds(row, 1), :],
            buf.at[slot_idx, pl.ds(r, 1), :],
            sems.at[slot_idx],
        )

    def _issue_tile(tile_idx, slot_idx):
        def body(r, carry):
            _row_copy(tile_idx, r, slot_idx).start()
            return carry
        lax.fori_loop(0, tile, body, 0, unroll=8)

    # Prime the pipeline with this (first) tile's rows.
    @pl.when(t == 0)
    def _():
        _issue_tile(0, 0)

    # Prefetch the NEXT tile's rows before waiting on the current ones, so the
    # HBM gather latency overlaps this step's wait + store.
    @pl.when(t + 1 < n_tiles)
    def _():
        _issue_tile(t + 1, (t + 1) % 2)

    # Wait for the current tile's rows; descriptors are structurally identical
    # to the ones used at start() (same source row, same (1, D) shape).
    def _wait_body(r, carry):
        _row_copy(t, r, slot).wait()
        return carry
    lax.fori_loop(0, tile, _wait_body, 0, unroll=8)

    out_ref[...] = (buf[slot].astype(jnp.float32) * scale).astype(out_ref.dtype)


def _token_embedding_dma(idx, weight, n_pad, tile, scale, out_dtype):
    _, d = weight.shape
    kernel = functools.partial(_dma_gather_kernel, tile=tile, scale=scale)
    return pl.pallas_call(
        kernel,
        out_shape=jax.ShapeDtypeStruct((n_pad, d), out_dtype),
        grid_spec=pltpu.PrefetchScalarGridSpec(
            num_scalar_prefetch=1,                               # ids -> SMEM
            grid=(n_pad // tile,),
            in_specs=[pl.BlockSpec(memory_space=pl.ANY)],        # table stays in HBM
            out_specs=pl.BlockSpec((tile, d), lambda t, idx_sref: (t, 0)),
            scratch_shapes=[
                pltpu.VMEM((2, tile, d), weight.dtype),
                pltpu.SemaphoreType.DMA((2,)),
            ],
        ),
        compiler_params=pltpu.CompilerParams(
            # cross-step prefetch carries state -> must run sequentially
            dimension_semantics=("arbitrary",),
        ),
    )(idx, weight)


# ----------------------------------------------------------------------------
# Public wrapper.
# ----------------------------------------------------------------------------
def token_embedding(x, weight, *, token_tile=512, mode="auto"):
    """x: (B, S) int token ids; weight: (V, D). Returns (B, S, D) in weight.dtype."""
    b, s = x.shape
    v, d = weight.shape
    n = b * s
    out_dtype = weight.dtype
    scale = float(d) ** 0.5

    # Token-tile: multiple of 8 (sublane), default 512 (per-step overhead amortized).
    tile = _round_up(min(token_tile, n), 8)
    n_pad = _round_up(n, tile)

    # PyTorch nn.Embedding would raise on out-of-range ids; here we clamp so we
    # never address outside the table (documented behavioral difference).
    idx = jnp.clip(x.reshape(n).astype(jnp.int32), 0, v - 1)
    if n_pad != n:
        # Pad with token 0 (the zero padding row); extra rows are sliced off.
        idx = jnp.concatenate([idx, jnp.zeros((n_pad - n,), jnp.int32)])

    if mode == "auto":
        v_pad = _round_up(max(v, _MXU_DIM), _MXU_DIM)
        itemsize = jnp.dtype(weight.dtype).itemsize
        need = (2 * v_pad * d * itemsize + tile * v_pad * 4
                + 4 * tile * d * 4 + 2 * tile * 4)
        if v_pad <= _ONE_HOT_MAX_V and need <= _FAST_PATH_VMEM_BUDGET:
            mode = "onehot"
        else:
            mode = "dma"

    if mode == "onehot":
        out = _token_embedding_onehot(idx, weight, n_pad, tile, scale, out_dtype)
    elif mode == "dma":
        out = _token_embedding_dma(idx, weight, n_pad, tile, scale, out_dtype)
    else:
        raise ValueError(f"unknown mode: {mode}")

    return out[:n].reshape(b, s, d)


def init_token_embedding_weight(key, vocab_size, embedding_dim):
    """Matches nn.init.normal_(std=dim**-0.5) with row 0 (padding_idx) zeroed."""
    w = jax.random.normal(key, (vocab_size, embedding_dim), dtype=jnp.float32)
    w = w * (embedding_dim ** -0.5)
    w = w.at[0].set(0.0)
    return w


if __name__ == "__main__":
    key = jax.random.PRNGKey(0)
    k_w, k_x = jax.random.split(key)

    vocab_size = 64
    embedding_dim = 32
    batch, seq = 2, 100   # n = 200 tokens

    weight = init_token_embedding_weight(k_w, vocab_size, embedding_dim)
    x = jax.random.randint(k_x, (batch, seq), minval=0, maxval=vocab_size,
                           dtype=jnp.int32)
    ref = weight[x] * (embedding_dim ** 0.5)

    # 1) Fast path: VMEM-resident table + one-hot MXU gather (auto-dispatched).
    out = jax.block_until_ready(token_embedding(x, weight))
    assert out.shape == (batch, seq, embedding_dim)
    assert jnp.allclose(out, ref, atol=1e-5, rtol=1e-5)

    # 2) Same fast path with a bf16 table (halves the resident-table footprint).
    w_bf16 = weight.astype(jnp.bfloat16)
    out_bf16 = jax.block_until_ready(token_embedding(x, w_bf16))
    ref_bf16 = w_bf16.astype(jnp.float32)[x] * (embedding_dim ** 0.5)
    assert jnp.allclose(out_bf16.astype(jnp.float32), ref_bf16, atol=2e-2, rtol=2e-2)

    # 3) Forced HBM row-gather fallback (large-vocab path); small tile so the
    #    grid has 4 steps and exercises cross-step double buffering + padding.
    out_dma = jax.block_until_ready(token_embedding(x, weight, token_tile=64, mode="dma"))
    assert jnp.allclose(out_dma, ref, atol=1e-5, rtol=1e-5)

    print("KERNEL_OK")
</pallas_src>

<mosaic_0001>
module attributes {stable_mosaic.version = 11 : i64} {
  func.func @_onehot_embed_kernel(%arg0: i32, %arg1: memref<200x1xi32, #tpu.memory_space<vmem>>, %arg2: memref<256x32xf32, #tpu.memory_space<vmem>>, %arg3: memref<200x32xf32, #tpu.memory_space<vmem>>) attributes {dimension_semantics = [#tpu.dimension_semantics<parallel>], iteration_bounds = array<i64: 1>, scalar_prefetch = 0 : i64, scratch_operands = 0 : i64, tpu.core_type = #tpu.core_type<tc>, window_params = [{transform_indices = @transform_0, window_bounds = array<i64: 200, 1>}, {pipeline_mode = #tpu.pipeline_mode<synchronous>, transform_indices = @transform_1, window_bounds = array<i64: 256, 32>}, {transform_indices = @transform_2, window_bounds = array<i64: 200, 32>}]} {
    %c0 = arith.constant 0 : index
    %c0_0 = arith.constant 0 : index
    %0 = vector.load %arg1[%c0, %c0_0] : memref<200x1xi32, #tpu.memory_space<vmem>>, vector<200x1xi32>
    %1 = tpu.iota {dimensions = array<i32: 1>} : vector<200x256xi32>
    %2 = vector.broadcast %0 : vector<200x1xi32> to vector<200x256xi32>
    %3 = arith.cmpi eq, %1, %2 : vector<200x256xi32>
    %4 = arith.extui %3 : vector<200x256xi1> to vector<200x256xi32>
    %5 = arith.sitofp %4 : vector<200x256xi32> to vector<200x256xf32>
    %c0_1 = arith.constant 0 : index
    %c0_2 = arith.constant 0 : index
    %6 = vector.load %arg2[%c0_1, %c0_2] : memref<256x32xf32, #tpu.memory_space<vmem>>, vector<256x32xf32>
    %cst = arith.constant dense<0.000000e+00> : vector<200x32xf32>
    %7 = tpu.matmul %5, %6, %cst {dimension_numbers = #tpu.dot_dimension_numbers<[1], [0], [0], [1], [0, 0, 1, 1], [], []>} : vector<200x256xf32>, vector<256x32xf32>, vector<200x32xf32> -> vector<200x32xf32>
    %cst_3 = arith.constant 5.65685415 : f32
    %8 = vector.broadcast %cst_3 : f32 to vector<200x32xf32>
    %9 = arith.mulf %7, %8 : vector<200x32xf32>
    %c0_4 = arith.constant 0 : index
    %c0_5 = arith.constant 0 : index
    %10 = vector.load %arg3[%c0_4, %c0_5] : memref<200x32xf32, #tpu.memory_space<vmem>>, vector<200x32xf32>
    tpu.vector_store %arg3[%c0_4, %c0_5], %9 {strides = array<i32>} : memref<200x32xf32, #tpu.memory_space<vmem>>, vector<200x32xf32>,
    return
  }
  func.func @transform_0(%arg0: i32) -> (i32, i32) {
    %c0_i32 = arith.constant 0 : i32
    %c0_i32_0 = arith.constant 0 : i32
    return %arg0, %c0_i32 : i32, i32
  }
  func.func @transform_1(%arg0: i32) -> (i32, i32) {
    %c0_i32 = arith.constant 0 : i32
    %c0_i32_0 = arith.constant 0 : i32
    %c0_i32_1 = arith.constant 0 : i32
    return %c0_i32, %c0_i32_0 : i32, i32
  }
  func.func @transform_2(%arg0: i32) -> (i32, i32) {
    %c0_i32 = arith.constant 0 : i32
    %c0_i32_0 = arith.constant 0 : i32
    return %arg0, %c0_i32 : i32, i32
  }
}

</mosaic_0001>

<bundles_post_ra>
// kernel: tpu_custom_call.1
= control target key start
LH: loop header
LB: loop body
LE: loop exit
PB: predicated region body
PF: predicated region fallthrough
CT: control target
= control target key end

     0   :  { %v710_v0 = vmov 0   ;;  %v711_v5 = vmov 0.0   ;;  %v36_v59 = vlaneseq  ;;  %s1168_s0 = inlined_call_operand.vmem [shape: s32[200,1], index: 0, kind: input, shape index: {}]   ;;  %s1169_s1 = inlined_call_operand.vmem [shape: f32[256,32], index: 1, kind: input, shape index: {}]   ;;  %s1170_s2 = inlined_call_operand.vmem [shape: f32[200,32], index: 2, kind: output, shape index: {}]  }
   0x1   :  { %709 = vset.pattern.permute.xlu1 %v710_v0  ;;  %708 = vset.pattern.permute.xlu0 %v710_v0  ;;  %v24_v1 = vld [vmem:[%s1168_s0 + $0x68] sm:$0xff]  ;;  %v11_v2 = vld [vmem:[%s1168_s0] sm:$0xff]  ;;  %v13_v3 = vld [vmem:[%s1168_s0 + $0x10] sm:$0xff]  ;;  %v712_v0 = vmov 1.0  }
   0x2   :  { %79 = vperm.xlu1 %709, %v24_v1   ;;  %40 = vperm.xlu0 %708, %v11_v2   ;;  %v12_v4 = vld [vmem:[%s1168_s0 + $0x8] sm:$0xff]  ;;  %v14_v6 = vld [vmem:[%s1168_s0 + $0x18] sm:$0xff]  ;;  %v25_v7 = vld [vmem:[%s1168_s0 + $0x70] sm:$0xff]  ;;  %v963_v60 = vand.u32 127, %v36_v59 }
   0x3   :  { %296 = vmatprep.subr.mxu0 %v711_v5  ;;  %641 = vmatprep.subr.mxu1 %v711_v5  ;;  %v279_v8 = vld [vmem:[%s1169_s1 + $0x78] sm:$0xff]  ;;  %v278_v9 = vld [vmem:[%s1169_s1 + $0x70] sm:$0xff]  ;;  %v15_v10 = vld [vmem:[%s1168_s0 + $0x20] sm:$0xff] }
   0x4   :  { %v26_v11 = vld [vmem:[%s1168_s0 + $0x78] sm:$0xff]  ;;  %297 = vmatpush1.msra.mxu0 %v279_v8  ;;  %673 = vmatpush1.msra.mxu1 %v279_v8  ;;  %v277_v12 = vld [vmem:[%s1169_s1 + $0x68] sm:$0xff]  ;;  %v27_v14 = vld [vmem:[%s1168_s0 + $0x80] sm:$0xff]  ;;  %v966_v61 = vadd.s32 128, %v963_v60 }
   0x5   :  { %298 = vmatprep.subr.mxu0 %v711_v5  ;;  %642 = vmatprep.subr.mxu1 %v711_v5  ;;  %v16_v13 = vld [vmem:[%s1168_s0 + $0x28] sm:$0xff]  ;;  %v276_v15 = vld [vmem:[%s1169_s1 + $0x60] sm:$0xff]  ;;  %v275_v16 = vld [vmem:[%s1169_s1 + $0x58] sm:$0xff] }
   0x6   :  { %46 = vperm.xlu1 %709, %v13_v3   ;;  %43 = vperm.xlu0 %708, %v12_v4   ;;  %v17_v17 = vld [vmem:[%s1168_s0 + $0x30] sm:$0xff]  ;;  %v28_v18 = vld [vmem:[%s1168_s0 + $0x88] sm:$0xff]  ;;  %v18_v20 = vld [vmem:[%s1168_s0 + $0x38] sm:$0xff] }
   0x7   :  { %299 = vmatpush1.msra.mxu0 %v278_v9  ;;  %674 = vmatpush1.msra.mxu1 %v278_v9  ;;  %v274_v19 = vld [vmem:[%s1169_s1 + $0x50] sm:$0xff]  ;;  %v273_v22 = vld [vmem:[%s1169_s1 + $0x48] sm:$0xff]  ;;  %v272_v23 = vld [vmem:[%s1169_s1 + $0x40] sm:$0xff] }
   0x8   :  { %300 = vmatprep.subr.mxu0 %v711_v5  ;;  %643 = vmatprep.subr.mxu1 %v711_v5  ;;  %v29_v21 = vld [vmem:[%s1168_s0 + $0x90] sm:$0xff]  ;;  %v19_v24 = vld [vmem:[%s1168_s0 + $0x40] sm:$0xff]  ;;  %v30_v25 = vld [vmem:[%s1168_s0 + $0x98] sm:$0xff] }
   0x9   :  { %301 = vmatpush1.msra.mxu0 %v277_v12  ;;  %675 = vmatpush1.msra.mxu1 %v277_v12  ;;  %v271_v26 = vld [vmem:[%s1169_s1 + $0x38] sm:$0xff]  ;;  %v20_v27 = vld [vmem:[%s1168_s0 + $0x48] sm:$0xff]  ;;  %v31_v28 = vld [vmem:[%s1168_s0 + $0xa0] sm:$0xff] }
   0xa   :  { %49 = vperm.xlu1 %709, %v14_v6   ;;  %82 = vperm.xlu0 %708, %v25_v7   ;;  %v270_v29 = vld [vmem:[%s1169_s1 + $0x30] sm:$0xff]  ;;  %v269_v30 = vld [vmem:[%s1169_s1 + $0x28] sm:$0xff]  ;;  %v268_v33 = vld [vmem:[%s1169_s1 + $0x20] sm:$0xff] }
   0xb   :  { %302 = vmatprep.subr.mxu0 %v711_v5  ;;  %644 = vmatprep.subr.mxu1 %v711_v5  ;;  %v21_v31 = vld [vmem:[%s1168_s0 + $0x50] sm:$0xff]  ;;  %v32_v32 = vld [vmem:[%s1168_s0 + $0xa8] sm:$0xff]  ;;  %v22_v34 = vld [vmem:[%s1168_s0 + $0x58] sm:$0xff] }
   0xc   :  { %303 = vmatpush1.msra.mxu0 %v276_v15  ;;  %676 = vmatpush1.msra.mxu1 %v276_v15  ;;  %v33_v35 = vld [vmem:[%s1168_s0 + $0xb0] sm:$0xff]  ;;  %v267_v36 = vld [vmem:[%s1169_s1 + $0x18] sm:$0xff]  ;;  %v23_v38 = vld [vmem:[%s1168_s0 + $0x60] sm:$0xff] }
   0xd   :  { %304 = vmatprep.subr.mxu0 %v711_v5  ;;  %645 = vmatprep.subr.mxu1 %v711_v5  ;;  %v266_v37 = vld [vmem:[%s1169_s1 + $0x10] sm:$0xff]  ;;  %v34_v39 = vld [vmem:[%s1168_s0 + $0xb8] sm:$0xff]  ;;  %v265_v40 = vld [vmem:[%s1169_s1 + $0x8] sm:$0xff] }
   0xe   :  { %52 = vperm.xlu1 %709, %v15_v10   ;;  %85 = vperm.xlu0 %708, %v26_v11   ;;  %v35_v41 = vld [vmem:[%s1168_s0 + $0xc0] sm:$0xff]  ;;  %v295_v43 = vld [vmem:[%s1169_s1 + $0xf8] sm:$0xff]  ;;  %v294_v44 = vld [vmem:[%s1169_s1 + $0xf0] sm:$0xff] }
   0xf   :  { %305 = vmatpush1.msra.mxu0 %v275_v16  ;;  %677 = vmatpush1.msra.mxu1 %v275_v16  ;;  %v264_v42 = vld [vmem:[%s1169_s1] sm:$0xff]  ;;  %v293_v45 = vld [vmem:[%s1169_s1 + $0xe8] sm:$0xff]  ;;  %v291_v47 = vld [vmem:[%s1169_s1 + $0xd8] sm:$0xff] }
  0x10   :  { %306 = vmatprep.subr.mxu0 %v711_v5  ;;  %646 = vmatprep.subr.mxu1 %v711_v5  ;;  %v292_v46 = vld [vmem:[%s1169_s1 + $0xe0] sm:$0xff]  ;;  %v290_v48 = vld [vmem:[%s1169_s1 + $0xd0] sm:$0xff]  ;;  %v289_v49 = vld [vmem:[%s1169_s1 + $0xc8] sm:$0xff] }
  0x11   :  { %307 = vmatpush1.msra.mxu0 %v274_v19  ;;  %678 = vmatpush1.msra.mxu1 %v274_v19  ;;  %v288_v50 = vld [vmem:[%s1169_s1 + $0xc0] sm:$0xff]  ;;  %v287_v51 = vld [vmem:[%s1169_s1 + $0xb8] sm:$0xff]  ;;  %v286_v52 = vld [vmem:[%s1169_s1 + $0xb0] sm:$0xff] }
  0x12   :  { %55 = vperm.xlu1 %709, %v16_v13   ;;  %88 = vperm.xlu0 %708, %v27_v14   ;;  %v285_v53 = vld [vmem:[%s1169_s1 + $0xa8] sm:$0xff]  ;;  %v284_v54 = vld [vmem:[%s1169_s1 + $0xa0] sm:$0xff]  ;;  %v283_v55 = vld [vmem:[%s1169_s1 + $0x98] sm:$0xff] }
  0x13   :  { %308 = vmatprep.subr.mxu0 %v711_v5  ;;  %647 = vmatprep.subr.mxu1 %v711_v5  ;;  %v282_v56 = vld [vmem:[%s1169_s1 + $0x90] sm:$0xff]  ;;  %v281_v57 = vld [vmem:[%s1169_s1 + $0x88] sm:$0xff]  ;;  %v280_v58 = vld [vmem:[%s1169_s1 + $0x80] sm:$0xff] }
  0x14   :  { %309 = vmatpush1.msra.mxu0 %v273_v22  ;;  %679 = vmatpush1.msra.mxu1 %v273_v22 }
  0x15   :  { %310 = vmatprep.subr.mxu0 %v711_v5  ;;  %648 = vmatprep.subr.mxu1 %v711_v5 }
  0x16   :  { %58 = vperm.xlu1 %709, %v17_v17   ;;  %91 = vperm.xlu0 %708, %v28_v18  }
  0x17   :  { %311 = vmatpush1.msra.mxu0 %v272_v23  ;;  %680 = vmatpush1.msra.mxu1 %v272_v23 }
  0x18   :  { %312 = vmatprep.subr.mxu0 %v711_v5  ;;  %649 = vmatprep.subr.mxu1 %v711_v5 }
  0x19   :  { %313 = vmatpush1.msra.mxu0 %v271_v26  ;;  %681 = vmatpush1.msra.mxu1 %v271_v26 }
  0x1a   :  { %61 = vperm.xlu1 %709, %v18_v20   ;;  %94 = vperm.xlu0 %708, %v29_v21  }
  0x1b   :  { %314 = vmatprep.subr.mxu0 %v711_v5  ;;  %650 = vmatprep.subr.mxu1 %v711_v5 }
  0x1c   :  { %315 = vmatpush1.msra.mxu0 %v270_v29  ;;  %682 = vmatpush1.msra.mxu1 %v270_v29 }
  0x1d   :  { %316 = vmatprep.subr.mxu0 %v711_v5  ;;  %651 = vmatprep.subr.mxu1 %v711_v5 }
  0x1e   :  { %64 = vperm.xlu1 %709, %v19_v24   ;;  %97 = vperm.xlu0 %708, %v30_v25  }
  0x1f   :  { %317 = vmatpush1.msra.mxu0 %v269_v30  ;;  %683 = vmatpush1.msra.mxu1 %v269_v30 }
  0x20   :  { %318 = vmatprep.subr.mxu0 %v711_v5  ;;  %652 = vmatprep.subr.mxu1 %v711_v5 }
  0x21   :  { %319 = vmatpush1.msra.mxu0 %v268_v33  ;;  %684 = vmatpush1.msra.mxu1 %v268_v33 }
  0x22   :  { %67 = vperm.xlu1 %709, %v20_v27   ;;  %100 = vperm.xlu0 %708, %v31_v28  }
  0x23   :  { %320 = vmatprep.subr.mxu0 %v711_v5  ;;  %653 = vmatprep.subr.mxu1 %v711_v5 }
  0x24   :  { %321 = vmatpush1.msra.mxu0 %v267_v36  ;;  %685 = vmatpush1.msra.mxu1 %v267_v36 }
  0x25   :  { %322 = vmatprep.subr.mxu0 %v711_v5  ;;  %654 = vmatprep.subr.mxu1 %v711_v5 }
  0x26   :  { %70 = vperm.xlu1 %709, %v21_v31   ;;  %103 = vperm.xlu0 %708, %v32_v32  }
  0x27   :  { %323 = vmatpush1.msra.mxu0 %v266_v37  ;;  %686 = vmatpush1.msra.mxu1 %v266_v37 }
  0x28   :  { %324 = vmatprep.subr.mxu0 %v711_v5  ;;  %655 = vmatprep.subr.mxu1 %v711_v5 }
  0x29   :  { %325 = vmatpush1.msra.mxu0 %v265_v40  ;;  %687 = vmatpush1.msra.mxu1 %v265_v40 }
  0x2a   :  { %73 = vperm.xlu1 %709, %v22_v34   ;;  %106 = vperm.xlu0 %708, %v33_v35  }
  0x2b   :  { %326 = vmatprep.subr.mxu0 %v711_v5  ;;  %656 = vmatprep.subr.mxu1 %v711_v5 }
  0x2c   :  { %327 = vmatpush1.msra.mxu0 %v264_v42  ;;  %688 = vmatpush1.msra.mxu1 %v264_v42 }
  0x2d   :  { %328 = vmatprep.subr.mxu0 %v711_v5  ;;  %657 = vmatprep.subr.mxu1 %v711_v5 }
  0x2e   :  { %76 = vperm.xlu1 %709, %v23_v38   ;;  %109 = vperm.xlu0 %708, %v34_v39  }
  0x2f   :  { %329 = vmatpush2.msra.mxu0 %v295_v43  ;;  %689 = vmatpush2.msra.mxu1 %v295_v43 }
  0x30   :  { %330 = vmatprep.subr.mxu0 %v711_v5  ;;  %658 = vmatprep.subr.mxu1 %v711_v5 }
  0x31   :  { %331 = vmatpush2.msra.mxu0 %v294_v44  ;;  %690 = vmatpush2.msra.mxu1 %v294_v44 }
  0x32   :  { %112 = vperm.xlu0 %708, %v35_v41   ;;  %332 = vmatprep.subr.mxu0 %v711_v5 }
  0x33   :  { %659 = vmatprep.subr.mxu1 %v711_v5  ;;  %333 = vmatpush2.msra.mxu0 %v293_v45 }
  0x34   :  { %691 = vmatpush2.msra.mxu1 %v293_v45  ;;  %334 = vmatprep.subr.mxu0 %v711_v5 }
  0x35   :  { %660 = vmatprep.subr.mxu1 %v711_v5  ;;  %335 = vmatpush2.msra.mxu0 %v292_v46 }
  0x36   :  { %692 = vmatpush2.msra.mxu1 %v292_v46  ;;  %336 = vmatprep.subr.mxu0 %v711_v5 }
  0x37   :  { %661 = vmatprep.subr.mxu1 %v711_v5  ;;  %337 = vmatpush2.msra.mxu0 %v291_v47 }
  0x38   :  { %693 = vmatpush2.msra.mxu1 %v291_v47  ;;  %338 = vmatprep.subr.mxu0 %v711_v5 }
  0x39   :  { %662 = vmatprep.subr.mxu1 %v711_v5  ;;  %339 = vmatpush2.msra.mxu0 %v290_v48 }
  0x3a   :  { %694 = vmatpush2.msra.mxu1 %v290_v48  ;;  %340 = vmatprep.subr.mxu0 %v711_v5 }
  0x3b   :  { %663 = vmatprep.subr.mxu1 %v711_v5  ;;  %341 = vmatpush2.msra.mxu0 %v289_v49 }
  0x3c   :  { %695 = vmatpush2.msra.mxu1 %v289_v49  ;;  %342 = vmatprep.subr.mxu0 %v711_v5 }
  0x3d   :  { %664 = vmatprep.subr.mxu1 %v711_v5  ;;  %343 = vmatpush2.msra.mxu0 %v288_v50 }
  0x3e   :  { %696 = vmatpush2.msra.mxu1 %v288_v50  ;;  %344 = vmatprep.subr.mxu0 %v711_v5 }
  0x3f   :  { %665 = vmatprep.subr.mxu1 %v711_v5  ;;  %345 = vmatpush2.msra.mxu0 %v287_v51 }
  0x40   :  { %697 = vmatpush2.msra.mxu1 %v287_v51  ;;  %346 = vmatprep.subr.mxu0 %v711_v5 }
  0x41   :  { %666 = vmatprep.subr.mxu1 %v711_v5  ;;  %347 = vmatpush2.msra.mxu0 %v286_v52 }
  0x42   :  { %698 = vmatpush2.msra.mxu1 %v286_v52  ;;  %348 = vmatprep.subr.mxu0 %v711_v5 }
  0x43   :  { %667 = vmatprep.subr.mxu1 %v711_v5  ;;  %349 = vmatpush2.msra.mxu0 %v285_v53 }
  0x44   :  { %699 = vmatpush2.msra.mxu1 %v285_v53  ;;  %350 = vmatprep.subr.mxu0 %v711_v5 }
  0x45   :  { %668 = vmatprep.subr.mxu1 %v711_v5  ;;  %351 = vmatpush2.msra.mxu0 %v284_v54 }
  0x46   :  { %700 = vmatpush2.msra.mxu1 %v284_v54  ;;  %352 = vmatprep.subr.mxu0 %v711_v5 }
  0x47   :  { %669 = vmatprep.subr.mxu1 %v711_v5  ;;  %353 = vmatpush2.msra.mxu0 %v283_v55 }
  0x48   :  { %701 = vmatpush2.msra.mxu1 %v283_v55  ;;  %354 = vmatprep.subr.mxu0 %v711_v5 }
  0x49   :  { %670 = vmatprep.subr.mxu1 %v711_v5  ;;  %355 = vmatpush2.msra.mxu0 %v282_v56 }
  0x4a   :  { %702 = vmatpush2.msra.mxu1 %v282_v56  ;;  %356 = vmatprep.subr.mxu0 %v711_v5 }
  0x4b   :  { %671 = vmatprep.subr.mxu1 %v711_v5  ;;  %357 = vmatpush2.msra.mxu0 %v281_v57 }
  0x4c   :  { %703 = vmatpush2.msra.mxu1 %v281_v57  ;;  %358 = vmatprep.subr.mxu0 %v711_v5 }
  0x4d   :  { %672 = vmatprep.subr.mxu1 %v711_v5  ;;  %359 = vmatpush2.msra.mxu0 %v280_v58 }
  0x4e   :  { %704 = vmatpush2.msra.mxu1 %v280_v58 }
  0x7d   :  { %v80_v62 = vpop.permute.xlu1 %79  ;;  %v41_v63 = vpop.permute.xlu0 %40 }
  0x7e   :  { %vm140_vm0 = vcmp.eq.s32.totalorder %v963_v60, %v80_v62  ;;  %vm114_vm1 = vcmp.eq.s32.totalorder %v963_v60, %v41_v63  ;;  %vm115_vm2 = vcmp.eq.s32.totalorder %v966_v61, %v41_v63  ;;  %vm141_vm3 = vcmp.eq.s32.totalorder %v966_v61, %v80_v62 }
  0x7f   :  { %591 = vmatprep.mubr.msk.f32.mxu0 %vm115_vm2, %v712_v0  ;;  %617 = vmatprep.mubr.msk.f32.mxu1 %vm141_vm3, %v712_v0 }
  0x80   :  { %592 = vmatmul.mubr.msk.f32.vlgmr.msra.gmra.mxu0 %vm114_vm1, %v712_v0  ;;  %618 = vmatmul.mubr.msk.f32.vlgmr.msra.gmra.mxu1 %vm140_vm0, %v712_v0 }
  0x81   :  { %v47_v1 = vpop.permute.xlu1 %46  ;;  %v44_v2 = vpop.permute.xlu0 %43 }
  0x82   :  { %vm116_vm4 = vcmp.eq.s32.totalorder %v963_v60, %v44_v2  ;;  %vm117_vm5 = vcmp.eq.s32.totalorder %v966_v61, %v44_v2  ;;  %vm119_vm6 = vcmp.eq.s32.totalorder %v966_v61, %v47_v1  ;;  %vm118_vm9 = vcmp.eq.s32.totalorder %v963_v60, %v47_v1 }
  0x83   :  { %593 = vmatprep.mubr.msk.f32.mxu0 %vm117_vm5, %v712_v0 }
  0x84   :  { %594 = vmatmul.mubr.msk.f32.gmra.mxu0 %vm116_vm4, %v712_v0 }
  0x85   :  { %v50_v3 = vpop.permute.xlu1 %49  ;;  %595 = vmatprep.mubr.msk.f32.mxu0 %vm119_vm6, %v712_v0  ;;  %v83_v4 = vpop.permute.xlu0 %82 }
  0x86   :  { %vm142_vm7 = vcmp.eq.s32.totalorder %v963_v60, %v83_v4  ;;  %vm143_vm8 = vcmp.eq.s32.totalorder %v966_v61, %v83_v4  ;;  %vm121_vm10 = vcmp.eq.s32.totalorder %v966_v61, %v50_v3  ;;  %vm120_vm13 = vcmp.eq.s32.totalorder %v963_v60, %v50_v3 }
  0x87   :  { %619 = vmatprep.mubr.msk.f32.mxu1 %vm143_vm8, %v712_v0 }
  0x88   :  { %596 = vmatmul.mubr.msk.f32.gmra.mxu0 %vm118_vm9, %v712_v0  ;;  %620 = vmatmul.mubr.msk.f32.gmra.mxu1 %vm142_vm7, %v712_v0 }
  0x89   :  { %v53_v5 = vpop.permute.xlu1 %52  ;;  %597 = vmatprep.mubr.msk.f32.mxu0 %vm121_vm10, %v712_v0  ;;  %v86_v6 = vpop.permute.xlu0 %85 }
  0x8a   :  { %vm144_vm11 = vcmp.eq.s32.totalorder %v963_v60, %v86_v6  ;;  %vm145_vm12 = vcmp.eq.s32.totalorder %v966_v61, %v86_v6  ;;  %vm123_vm14 = vcmp.eq.s32.totalorder %v966_v61, %v53_v5  ;;  %vm122_vm1 = vcmp.eq.s32.totalorder %v963_v60, %v53_v5 }
  0x8b   :  { %621 = vmatprep.mubr.msk.f32.mxu1 %vm145_vm12, %v712_v0 }
  0x8c   :  { %598 = vmatmul.mubr.msk.f32.gmra.mxu0 %vm120_vm13, %v712_v0  ;;  %622 = vmatmul.mubr.msk.f32.gmra.mxu1 %vm144_vm11, %v712_v0 }
  0x8d   :  { %v56_v7 = vpop.permute.xlu1 %55  ;;  %599 = vmatprep.mubr.msk.f32.mxu0 %vm123_vm14, %v712_v0  ;;  %v89_v8 = vpop.permute.xlu0 %88 }
  0x8e   :  { %vm146_vm15 = vcmp.eq.s32.totalorder %v963_v60, %v89_v8  ;;  %vm147_vm0 = vcmp.eq.s32.totalorder %v966_v61, %v89_v8  ;;  %vm125_vm2 = vcmp.eq.s32.totalorder %v966_v61, %v56_v7  ;;  %vm124_vm5 = vcmp.eq.s32.totalorder %v963_v60, %v56_v7 }
  0x8f   :  { %623 = vmatprep.mubr.msk.f32.mxu1 %vm147_vm0, %v712_v0 }
  0x90   :  { %600 = vmatmul.mubr.msk.f32.gmra.mxu0 %vm122_vm1, %v712_v0  ;;  %624 = vmatmul.mubr.msk.f32.gmra.mxu1 %vm146_vm15, %v712_v0 }
  0x91   :  { %v59_v9 = vpop.permute.xlu1 %58  ;;  %601 = vmatprep.mubr.msk.f32.mxu0 %vm125_vm2, %v712_v0  ;;  %v92_v10 = vpop.permute.xlu0 %91 }
  0x92   :  { %vm148_vm3 = vcmp.eq.s32.totalorder %v963_v60, %v92_v10  ;;  %vm149_vm4 = vcmp.eq.s32.totalorder %v966_v61, %v92_v10  ;;  %vm127_vm6 = vcmp.eq.s32.totalorder %v966_v61, %v59_v9  ;;  %vm126_vm9 = vcmp.eq.s32.totalorder %v963_v60, %v59_v9 }
  0x93   :  { %625 = vmatprep.mubr.msk.f32.mxu1 %vm149_vm4, %v712_v0 }
  0x94   :  { %602 = vmatmul.mubr.msk.f32.gmra.mxu0 %vm124_vm5, %v712_v0  ;;  %626 = vmatmul.mubr.msk.f32.gmra.mxu1 %vm148_vm3, %v712_v0 }
  0x95   :  { %v62_v11 = vpop.permute.xlu1 %61  ;;  %603 = vmatprep.mubr.msk.f32.mxu0 %vm127_vm6, %v712_v0  ;;  %v95_v12 = vpop.permute.xlu0 %94 }
  0x96   :  { %vm150_vm7 = vcmp.eq.s32.totalorder %v963_v60, %v95_v12  ;;  %vm151_vm8 = vcmp.eq.s32.totalorder %v966_v61, %v95_v12  ;;  %vm129_vm10 = vcmp.eq.s32.totalorder %v966_v61, %v62_v11  ;;  %vm128_vm13 = vcmp.eq.s32.totalorder %v963_v60, %v62_v11 }
  0x97   :  { %627 = vmatprep.mubr.msk.f32.mxu1 %vm151_vm8, %v712_v0 }
  0x98   :  { %604 = vmatmul.mubr.msk.f32.gmra.mxu0 %vm126_vm9, %v712_v0  ;;  %628 = vmatmul.mubr.msk.f32.gmra.mxu1 %vm150_vm7, %v712_v0 }
  0x99   :  { %v65_v13 = vpop.permute.xlu1 %64  ;;  %605 = vmatprep.mubr.msk.f32.mxu0 %vm129_vm10, %v712_v0  ;;  %v98_v14 = vpop.permute.xlu0 %97 }
  0x9a   :  { %vm152_vm11 = vcmp.eq.s32.totalorder %v963_v60, %v98_v14  ;;  %vm153_vm12 = vcmp.eq.s32.totalorder %v966_v61, %v98_v14  ;;  %vm131_vm14 = vcmp.eq.s32.totalorder %v966_v61, %v65_v13  ;;  %vm130_vm1 = vcmp.eq.s32.totalorder %v963_v60, %v65_v13 }
  0x9b   :  { %629 = vmatprep.mubr.msk.f32.mxu1 %vm153_vm12, %v712_v0 }
  0x9c   :  { %606 = vmatmul.mubr.msk.f32.gmra.mxu0 %vm128_vm13, %v712_v0  ;;  %630 = vmatmul.mubr.msk.f32.gmra.mxu1 %vm152_vm11, %v712_v0 }
  0x9d   :  { %v68_v15 = vpop.permute.xlu1 %67  ;;  %607 = vmatprep.mubr.msk.f32.mxu0 %vm131_vm14, %v712_v0  ;;  %v101_v16 = vpop.permute.xlu0 %100 }
  0x9e   :  { %vm154_vm15 = vcmp.eq.s32.totalorder %v963_v60, %v101_v16  ;;  %vm155_vm0 = vcmp.eq.s32.totalorder %v966_v61, %v101_v16  ;;  %vm133_vm2 = vcmp.eq.s32.totalorder %v966_v61, %v68_v15  ;;  %vm132_vm5 = vcmp.eq.s32.totalorder %v963_v60, %v68_v15 }
  0x9f   :  { %631 = vmatprep.mubr.msk.f32.mxu1 %vm155_vm0, %v712_v0 }
  0xa0   :  { %608 = vmatmul.mubr.msk.f32.gmra.mxu0 %vm130_vm1, %v712_v0  ;;  %632 = vmatmul.mubr.msk.f32.gmra.mxu1 %vm154_vm15, %v712_v0 }
  0xa1   :  { %v71_v17 = vpop.permute.xlu1 %70  ;;  %609 = vmatprep.mubr.msk.f32.mxu0 %vm133_vm2, %v712_v0  ;;  %v104_v18 = vpop.permute.xlu0 %103  ;;  %vm511_vm2 = vcmask 261120  }
  0xa2   :  { %vm156_vm3 = vcmp.eq.s32.totalorder %v963_v60, %v104_v18  ;;  %vm157_vm4 = vcmp.eq.s32.totalorder %v966_v61, %v104_v18  ;;  %vm135_vm6 = vcmp.eq.s32.totalorder %v966_v61, %v71_v17  ;;  %vm134_vm9 = vcmp.eq.s32.totalorder %v963_v60, %v71_v17 }
  0xa3   :  { %633 = vmatprep.mubr.msk.f32.mxu1 %vm157_vm4, %v712_v0 }
  0xa4   :  { %610 = vmatmul.mubr.msk.f32.gmra.mxu0 %vm132_vm5, %v712_v0  ;;  %634 = vmatmul.mubr.msk.f32.gmra.mxu1 %vm156_vm3, %v712_v0 }
  0xa5   :  { %v74_v19 = vpop.permute.xlu1 %73  ;;  %611 = vmatprep.mubr.msk.f32.mxu0 %vm135_vm6, %v712_v0  ;;  %v107_v20 = vpop.permute.xlu0 %106 }
  0xa6   :  { %vm158_vm7 = vcmp.eq.s32.totalorder %v963_v60, %v107_v20  ;;  %vm159_vm8 = vcmp.eq.s32.totalorder %v966_v61, %v107_v20  ;;  %vm137_vm10 = vcmp.eq.s32.totalorder %v966_v61, %v74_v19  ;;  %vm136_vm13 = vcmp.eq.s32.totalorder %v963_v60, %v74_v19 }
  0xa7   :  { %635 = vmatprep.mubr.msk.f32.mxu1 %vm159_vm8, %v712_v0 }
  0xa8   :  { %612 = vmatmul.mubr.msk.f32.gmra.mxu0 %vm134_vm9, %v712_v0  ;;  %636 = vmatmul.mubr.msk.f32.gmra.mxu1 %vm158_vm7, %v712_v0 }
  0xa9   :  { %v77_v21 = vpop.permute.xlu1 %76  ;;  %613 = vmatprep.mubr.msk.f32.mxu0 %vm137_vm10, %v712_v0  ;;  %v110_v22 = vpop.permute.xlu0 %109 }
  0xaa   :  { %vm160_vm11 = vcmp.eq.s32.totalorder %v963_v60, %v110_v22  ;;  %vm161_vm12 = vcmp.eq.s32.totalorder %v966_v61, %v110_v22  ;;  %vm139_vm14 = vcmp.eq.s32.totalorder %v966_v61, %v77_v21  ;;  %vm138_vm1 = vcmp.eq.s32.totalorder %v963_v60, %v77_v21 }
  0xab   :  { %637 = vmatprep.mubr.msk.f32.mxu1 %vm161_vm12, %v712_v0 }
  0xac   :  { %614 = vmatmul.mubr.msk.f32.gmra.mxu0 %vm136_vm13, %v712_v0  ;;  %638 = vmatmul.mubr.msk.f32.gmra.mxu1 %vm160_vm11, %v712_v0 }
  0xad   :  { %615 = vmatprep.mubr.msk.f32.mxu0 %vm139_vm14, %v712_v0  ;;  %v113_v23 = vpop.permute.xlu0 %112 }
  0xae   :  { %vm162_vm15 = vcmp.eq.s32.totalorder %v963_v60, %v113_v23  ;;  %vm163_vm0 = vcmp.eq.s32.totalorder %v966_v61, %v113_v23 }
  0xaf   :  { %639 = vmatprep.mubr.msk.f32.mxu1 %vm163_vm0, %v712_v0 }
  0xb0   :  { %616 = vmatmul.mubr.msk.f32.gmra.mxu0 %vm138_vm1, %v712_v0  ;;  %640 = vmatmul.mubr.msk.f32.gmra.mxu1 %vm162_vm15, %v712_v0 }
 0x140   :  { %v362_v24 = vpop.f32.mrf.mxu0  ;;  %v427_v25 = vpop.f32.mrf.mxu1 }
 0x141   :  { %v486_v26 = vmul.f32 5.656854, %v362_v24  ;;  %v499_v27 = vmul.f32 5.656854, %v427_v25 }
 0x142   :  { %v364_v28 = vpop.f32.mrf.mxu0  ;;  %v429_v29 = vpop.f32.mrf.mxu1 }
 0x143   :  { %512 = vst.msk [vmem:[%s1170_s2] sm:$0xff] %vm511_vm2, %v486_v26  ;;  %525 = vst.msk [vmem:[%s1170_s2 + $0x68] sm:$0xff] %vm511_vm2, %v499_v27 }
 0x144   :  { %v367_v30 = vpop.f32.mrf.mxu0 }
 0x145   :  { %v487_v31 = vmul.f32 5.656854, %v367_v30 }
 0x146   :  { %v369_v32 = vpop.f32.mrf.mxu0 }
 0x147   :  { %513 = vst.msk [vmem:[%s1170_s2 + $0x8] sm:$0xff] %vm511_vm2, %v487_v31 }
 0x148   :  { %v372_v33 = vpop.f32.mrf.mxu0  ;;  %v432_v34 = vpop.f32.mrf.mxu1 }
 0x149   :  { %v488_v35 = vmul.f32 5.656854, %v372_v33  ;;  %v500_v36 = vmul.f32 5.656854, %v432_v34 }
 0x14a   :  { %v374_v37 = vpop.f32.mrf.mxu0  ;;  %v434_v38 = vpop.f32.mrf.mxu1 }
 0x14b   :  { %514 = vst.msk [vmem:[%s1170_s2 + $0x10] sm:$0xff] %vm511_vm2, %v488_v35  ;;  %526 = vst.msk [vmem:[%s1170_s2 + $0x70] sm:$0xff] %vm511_vm2, %v500_v36 }
 0x14c   :  { %v377_v39 = vpop.f32.mrf.mxu0  ;;  %v437_v40 = vpop.f32.mrf.mxu1 }
 0x14d   :  { %v489_v41 = vmul.f32 5.656854, %v377_v39  ;;  %v501_v42 = vmul.f32 5.656854, %v437_v40 }
 0x14e   :  { %v379_v43 = vpop.f32.mrf.mxu0  ;;  %v439_v44 = vpop.f32.mrf.mxu1 }
 0x14f   :  { %515 = vst.msk [vmem:[%s1170_s2 + $0x18] sm:$0xff] %vm511_vm2, %v489_v41  ;;  %527 = vst.msk [vmem:[%s1170_s2 + $0x78] sm:$0xff] %vm511_vm2, %v501_v42 }
 0x150   :  { %v382_v45 = vpop.f32.mrf.mxu0  ;;  %v442_v46 = vpop.f32.mrf.mxu1 }
 0x151   :  { %v490_v47 = vmul.f32 5.656854, %v382_v45  ;;  %v502_v48 = vmul.f32 5.656854, %v442_v46 }
 0x152   :  { %v384_v49 = vpop.f32.mrf.mxu0  ;;  %v444_v50 = vpop.f32.mrf.mxu1 }
 0x153   :  { %516 = vst.msk [vmem:[%s1170_s2 + $0x20] sm:$0xff] %vm511_vm2, %v490_v47  ;;  %528 = vst.msk [vmem:[%s1170_s2 + $0x80] sm:$0xff] %vm511_vm2, %v502_v48 }
 0x154   :  { %v387_v51 = vpop.f32.mrf.mxu0  ;;  %v447_v52 = vpop.f32.mrf.mxu1 }
 0x155   :  { %v491_v53 = vmul.f32 5.656854, %v387_v51  ;;  %v503_v54 = vmul.f32 5.656854, %v447_v52 }
 0x156   :  { %v389_v55 = vpop.f32.mrf.mxu0  ;;  %v449_v56 = vpop.f32.mrf.mxu1 }
 0x157   :  { %517 = vst.msk [vmem:[%s1170_s2 + $0x28] sm:$0xff] %vm511_vm2, %v491_v53  ;;  %529 = vst.msk [vmem:[%s1170_s2 + $0x88] sm:$0xff] %vm511_vm2, %v503_v54 }
 0x158   :  { %v392_v57 = vpop.f32.mrf.mxu0  ;;  %v452_v58 = vpop.f32.mrf.mxu1 }
 0x159   :  { %v492_v59 = vmul.f32 5.656854, %v392_v57  ;;  %v504_v60 = vmul.f32 5.656854, %v452_v58 }
 0x15a   :  { %v394_v61 = vpop.f32.mrf.mxu0  ;;  %v454_v62 = vpop.f32.mrf.mxu1 }
 0x15b   :  { %518 = vst.msk [vmem:[%s1170_s2 + $0x30] sm:$0xff] %vm511_vm2, %v492_v59  ;;  %530 = vst.msk [vmem:[%s1170_s2 + $0x90] sm:$0xff] %vm511_vm2, %v504_v60 }
 0x15c   :  { %v397_v63 = vpop.f32.mrf.mxu0  ;;  %v457_v0 = vpop.f32.mrf.mxu1 }
 0x15d   :  { %v493_v1 = vmul.f32 5.656854, %v397_v63  ;;  %v505_v2 = vmul.f32 5.656854, %v457_v0 }
 0x15e   :  { %v399_v3 = vpop.f32.mrf.mxu0  ;;  %v459_v4 = vpop.f32.mrf.mxu1 }
 0x15f   :  { %519 = vst.msk [vmem:[%s1170_s2 + $0x38] sm:$0xff] %vm511_vm2, %v493_v1  ;;  %531 = vst.msk [vmem:[%s1170_s2 + $0x98] sm:$0xff] %vm511_vm2, %v505_v2 }
 0x160   :  { %v402_v5 = vpop.f32.mrf.mxu0  ;;  %v462_v6 = vpop.f32.mrf.mxu1 }
 0x161   :  { %v494_v7 = vmul.f32 5.656854, %v402_v5  ;;  %v506_v8 = vmul.f32 5.656854, %v462_v6 }
 0x162   :  { %v404_v9 = vpop.f32.mrf.mxu0  ;;  %v464_v10 = vpop.f32.mrf.mxu1 }
 0x163   :  { %520 = vst.msk [vmem:[%s1170_s2 + $0x40] sm:$0xff] %vm511_vm2, %v494_v7  ;;  %532 = vst.msk [vmem:[%s1170_s2 + $0xa0] sm:$0xff] %vm511_vm2, %v506_v8 }
 0x164   :  { %v407_v11 = vpop.f32.mrf.mxu0  ;;  %v467_v12 = vpop.f32.mrf.mxu1 }
 0x165   :  { %v495_v13 = vmul.f32 5.656854, %v407_v11  ;;  %v507_v14 = vmul.f32 5.656854, %v467_v12 }
 0x166   :  { %v409_v15 = vpop.f32.mrf.mxu0  ;;  %v469_v16 = vpop.f32.mrf.mxu1 }
 0x167   :  { %521 = vst.msk [vmem:[%s1170_s2 + $0x48] sm:$0xff] %vm511_vm2, %v495_v13  ;;  %533 = vst.msk [vmem:[%s1170_s2 + $0xa8] sm:$0xff] %vm511_vm2, %v507_v14 }
 0x168   :  { %v412_v17 = vpop.f32.mrf.mxu0  ;;  %v472_v18 = vpop.f32.mrf.mxu1 }
 0x169   :  { %v496_v19 = vmul.f32 5.656854, %v412_v17  ;;  %v508_v20 = vmul.f32 5.656854, %v472_v18 }
 0x16a   :  { %v414_v21 = vpop.f32.mrf.mxu0  ;;  %v474_v22 = vpop.f32.mrf.mxu1 }
 0x16b   :  { %522 = vst.msk [vmem:[%s1170_s2 + $0x50] sm:$0xff] %vm511_vm2, %v496_v19  ;;  %534 = vst.msk [vmem:[%s1170_s2 + $0xb0] sm:$0xff] %vm511_vm2, %v508_v20 }
 0x16c   :  { %v417_v23 = vpop.f32.mrf.mxu0  ;;  %v477_v24 = vpop.f32.mrf.mxu1 }
 0x16d   :  { %v497_v25 = vmul.f32 5.656854, %v417_v23  ;;  %v509_v26 = vmul.f32 5.656854, %v477_v24 }
 0x16e   :  { %v419_v27 = vpop.f32.mrf.mxu0  ;;  %v479_v28 = vpop.f32.mrf.mxu1 }
 0x16f   :  { %523 = vst.msk [vmem:[%s1170_s2 + $0x58] sm:$0xff] %vm511_vm2, %v497_v25  ;;  %535 = vst.msk [vmem:[%s1170_s2 + $0xb8] sm:$0xff] %vm511_vm2, %v509_v26 }
 0x170   :  { %v422_v29 = vpop.f32.mrf.mxu0  ;;  %v482_v30 = vpop.f32.mrf.mxu1 }
 0x171   :  { %v498_v31 = vmul.f32 5.656854, %v422_v29  ;;  %v510_v32 = vmul.f32 5.656854, %v482_v30 }
 0x172   :  { %v424_v33 = vpop.f32.mrf.mxu0  ;;  %v484_v34 = vpop.f32.mrf.mxu1 }
 0x173   :  { %524 = vst.msk [vmem:[%s1170_s2 + $0x60] sm:$0xff] %vm511_vm2, %v498_v31  ;;  %536 = vst.msk [vmem:[%s1170_s2 + $0xc0] sm:$0xff] %vm511_vm2, %v510_v32 }

</bundles_post_ra>
